<compile_context>
chip_gen: v6e
topology: v6e:2x2x1
jax: 0.10.0
libtpu: 0.0.40
codegen_flags: <defaults>
</compile_context>

<pallas_src>
import functools

import jax
import jax.numpy as jnp
from jax.experimental import pallas as pl
from jax.experimental.pallas import tpu as pltpu


def _mlp_kernel(activation, x_ref, *refs):
    """Full MLP forward on one batch tile, computed transposed.

    refs = (W0, b0, W1, b1, ..., W_last, b_last, out_ref)
    x_ref block:   (in_dim, tile_m)            -- batch on the lane axis
    W_l:           (out_features, in_features) -- PyTorch Linear layout
    b_l:           (out_features, 1)           -- lane-splat broadcast
    out_ref block: (out_dim, tile_m)           -- stored directly, lane-dense
    Hidden layers get the nonlinearity; the final Linear does not.
    """
    out_ref = refs[-1]
    wrefs = refs[:-1]
    n_layers = len(wrefs) // 2

    h = x_ref[...]                                           # (in_dim, tile_m) f32
    for layer in range(n_layers):
        w = wrefs[2 * layer][...]                            # (out_f, in_f)
        b = wrefs[2 * layer + 1][...]                        # (out_f, 1)
        h = jnp.dot(w, h, preferred_element_type=jnp.float32) + b
        if layer < n_layers - 1:                             # activation on hidden layers only
            h = jnp.tanh(h) if activation == "tanh" else jnp.maximum(h, 0.0)
    out_ref[...] = h.astype(out_ref.dtype)                   # lane-dense (out_dim, tile_m) store


def _pick_tiling(batch):
    """Returns (tile_m, padded_batch).

    batch <= 128: one clean 128-lane tile (unmasked loads/stores).
    batch  > 128: tile_m of 256 or 512 (MXU-N friendly on v6e/v7x, no vreg spill),
    padded so the tile count is even and >= 2 (keeps both v7x TensorCores busy).
    """
    if batch <= 128:
        return 128, 128
    tile = 256 if batch <= 512 else 512
    padded = pl.cdiv(batch, 2 * tile) * (2 * tile)
    return tile, padded


def mlp_forward(x, params, *, activation="tanh", tile_m=None):
    """x: (batch, in_dim). params: list of (W, b) with W (out, in), b (out, 1).

    Returns (batch, out_dim).
    """
    batch, in_dim = x.shape
    out_dim = params[-1][0].shape[0]

    if tile_m is None:
        tile_m, padded = _pick_tiling(batch)
    else:
        padded = pl.cdiv(batch, tile_m) * tile_m
    n_tiles = padded // tile_m

    # One wrapper copy total: transpose to (in_dim, batch) and pad the lane axis.
    x_t = x.T
    if padded != batch:
        x_t = jnp.pad(x_t, ((0, 0), (0, padded - batch)))

    # Batch rides the lane axis; feature dims (< 128) span their full array extent.
    in_specs = [pl.BlockSpec((in_dim, tile_m), lambda i: (0, i))]
    flat_args = [x_t]
    for w, b in params:
        in_specs.append(pl.BlockSpec(w.shape, lambda i: (0, 0)))  # whole weight resident
        in_specs.append(pl.BlockSpec(b.shape, lambda i: (0, 0)))
        flat_args += [w, b]

    out_specs = pl.BlockSpec((out_dim, tile_m), lambda i: (0, i))

    out_t = pl.pallas_call(
        functools.partial(_mlp_kernel, activation),
        out_shape=jax.ShapeDtypeStruct((out_dim, padded), x.dtype),
        grid_spec=pltpu.PrefetchScalarGridSpec(
            num_scalar_prefetch=0,
            grid=(n_tiles,),
            in_specs=in_specs,
            out_specs=out_specs,
        ),
        compiler_params=pltpu.CompilerParams(
            dimension_semantics=("parallel",),      # megacore-shardable on v7x
            vmem_limit_bytes=32 * 1024 * 1024,      # explicit, safe on v5e/v6e/v7x
        ),
    )(*flat_args)

    return out_t.T[:batch]                          # (batch, out_dim); padded rows dropped


def init_params(key, input_size, output_size, depth, width, activation="tanh"):
    """Matches the PyTorch module's init, in PyTorch's native (out, in) weight layout.

    Hidden Linear(prev, width): xavier_uniform (tanh) / kaiming_uniform(relu) weights,
    PyTorch-default uniform(-1/sqrt(fan_in), 1/sqrt(fan_in)) biases.
    Final Linear(prev, output_size): PyTorch-default uniform init for W and b.
    Biases are returned as (out, 1) for the transposed kernel. Handles depth == 0.
    """
    sizes = []
    prev = input_size
    for _ in range(depth):
        sizes.append((prev, width))
        prev = width
    sizes.append((prev, output_size))

    params = []
    for idx, (fan_in, fan_out) in enumerate(sizes):
        key, kw, kb = jax.random.split(key, 3)
        is_last = idx == len(sizes) - 1
        if not is_last and activation == "tanh":
            bound = (6.0 / (fan_in + fan_out)) ** 0.5          # xavier_uniform
        elif not is_last and activation == "relu":
            bound = (6.0 / fan_in) ** 0.5                       # kaiming_uniform (relu gain)
        else:
            bound = 1.0 / (fan_in ** 0.5)                       # PyTorch Linear default
        w = jax.random.uniform(kw, (fan_out, fan_in), jnp.float32, -bound, bound)
        b_bound = 1.0 / (fan_in ** 0.5)
        b = jax.random.uniform(kb, (fan_out, 1), jnp.float32, -b_bound, b_bound)
        params.append((w, b))
    return params


def mlp_forward_ref(x, params, activation="tanh"):
    h = x
    for i, (w, b) in enumerate(params):
        h = h @ w.T + b.T
        if i < len(params) - 1:
            h = jnp.tanh(h) if activation == "tanh" else jnp.maximum(h, 0.0)
    return h


if __name__ == "__main__":
    input_size = 4      # bank-note dataset has 4 features
    output_size = 1
    depth = 3
    width = 32

    key = jax.random.PRNGKey(0)

    # Case 1: tanh MLP, batch that maps to one clean 128-lane tile.
    key, kx1, kp1 = jax.random.split(key, 3)
    x1 = jax.random.normal(kx1, (128, input_size), dtype=jnp.float32)
    params1 = init_params(kp1, input_size, output_size, depth, width, "tanh")
    out1 = jax.block_until_ready(mlp_forward(x1, params1, activation="tanh"))
    ref1 = mlp_forward_ref(x1, params1, "tanh")
    assert out1.shape == (128, output_size)
    assert jnp.allclose(out1, ref1, atol=1e-5, rtol=1e-5), "tanh mismatch vs reference"

    # Case 2: relu MLP, ragged small batch (exercises padding path).
    key, kx2, kp2 = jax.random.split(key, 3)
    x2 = jax.random.normal(kx2, (100, input_size), dtype=jnp.float32)
    params2 = init_params(kp2, input_size, output_size, depth, width, "relu")
    out2 = jax.block_until_ready(mlp_forward(x2, params2, activation="relu"))
    ref2 = mlp_forward_ref(x2, params2, "relu")
    assert out2.shape == (100, output_size)
    assert jnp.allclose(out2, ref2, atol=1e-5, rtol=1e-5), "relu mismatch vs reference"

    # Case 3: tanh MLP, multi-tile batch (even tile count, 256-wide tiles).
    key, kx3 = jax.random.split(key)
    x3 = jax.random.normal(kx3, (300, input_size), dtype=jnp.float32)
    out3 = jax.block_until_ready(mlp_forward(x3, params1, activation="tanh"))
    ref3 = mlp_forward_ref(x3, params1, "tanh")
    assert out3.shape == (300, output_size)
    assert jnp.allclose(out3, ref3, atol=1e-5, rtol=1e-5), "multi-tile mismatch vs reference"

    print("KERNEL_OK")
</pallas_src>

<mosaic_0001>
module attributes {stable_mosaic.version = 11 : i64} {
  func.func @_mlp_kernel(%arg0: i32, %arg1: memref<4x128xf32, #tpu.memory_space<vmem>>, %arg2: memref<32x4xf32, #tpu.memory_space<vmem>>, %arg3: memref<32x1xf32, #tpu.memory_space<vmem>>, %arg4: memref<32x32xf32, #tpu.memory_space<vmem>>, %arg5: memref<32x1xf32, #tpu.memory_space<vmem>>, %arg6: memref<32x32xf32, #tpu.memory_space<vmem>>, %arg7: memref<32x1xf32, #tpu.memory_space<vmem>>, %arg8: memref<1x32xf32, #tpu.memory_space<vmem>>, %arg9: memref<1x1xf32, #tpu.memory_space<vmem>>, %arg10: memref<1x128xf32, #tpu.memory_space<vmem>>) attributes {dimension_semantics = [#tpu.dimension_semantics<parallel>], iteration_bounds = array<i64: 1>, scalar_prefetch = 0 : i64, scratch_operands = 0 : i64, tpu.core_type = #tpu.core_type<tc>, window_params = [{transform_indices = @transform_0, window_bounds = array<i64: 4, 128>}, {pipeline_mode = #tpu.pipeline_mode<synchronous>, transform_indices = @transform_1, window_bounds = array<i64: 32, 4>}, {pipeline_mode = #tpu.pipeline_mode<synchronous>, transform_indices = @transform_2, window_bounds = array<i64: 32, 1>}, {pipeline_mode = #tpu.pipeline_mode<synchronous>, transform_indices = @transform_3, window_bounds = array<i64: 32, 32>}, {pipeline_mode = #tpu.pipeline_mode<synchronous>, transform_indices = @transform_4, window_bounds = array<i64: 32, 1>}, {pipeline_mode = #tpu.pipeline_mode<synchronous>, transform_indices = @transform_5, window_bounds = array<i64: 32, 32>}, {pipeline_mode = #tpu.pipeline_mode<synchronous>, transform_indices = @transform_6, window_bounds = array<i64: 32, 1>}, {pipeline_mode = #tpu.pipeline_mode<synchronous>, transform_indices = @transform_7, window_bounds = array<i64: 1, 32>}, {pipeline_mode = #tpu.pipeline_mode<synchronous>, transform_indices = @transform_8, window_bounds = array<i64: 1, 1>}, {transform_indices = @transform_9, window_bounds = array<i64: 1, 128>}]} {
    %c0 = arith.constant 0 : index
    %c0_0 = arith.constant 0 : index
    %0 = vector.load %arg1[%c0, %c0_0] : memref<4x128xf32, #tpu.memory_space<vmem>>, vector<4x128xf32>
    %c0_1 = arith.constant 0 : index
    %c0_2 = arith.constant 0 : index
    %1 = vector.load %arg2[%c0_1, %c0_2] : memref<32x4xf32, #tpu.memory_space<vmem>>, vector<32x4xf32>
    %c0_3 = arith.constant 0 : index
    %c0_4 = arith.constant 0 : index
    %2 = vector.load %arg3[%c0_3, %c0_4] : memref<32x1xf32, #tpu.memory_space<vmem>>, vector<32x1xf32>
    %cst = arith.constant dense<0.000000e+00> : vector<32x128xf32>
    %3 = tpu.matmul %1, %0, %cst {dimension_numbers = #tpu.dot_dimension_numbers<[1], [0], [0], [1], [0, 0, 1, 1], [], []>} : vector<32x4xf32>, vector<4x128xf32>, vector<32x128xf32> -> vector<32x128xf32>
    %4 = vector.broadcast %2 : vector<32x1xf32> to vector<32x128xf32>
    %5 = arith.addf %3, %4 : vector<32x128xf32>
    %6 = math.tanh %5 : vector<32x128xf32>
    %c0_5 = arith.constant 0 : index
    %c0_6 = arith.constant 0 : index
    %7 = vector.load %arg4[%c0_5, %c0_6] : memref<32x32xf32, #tpu.memory_space<vmem>>, vector<32x32xf32>
    %c0_7 = arith.constant 0 : index
    %c0_8 = arith.constant 0 : index
    %8 = vector.load %arg5[%c0_7, %c0_8] : memref<32x1xf32, #tpu.memory_space<vmem>>, vector<32x1xf32>
    %cst_9 = arith.constant dense<0.000000e+00> : vector<32x128xf32>
    %9 = tpu.matmul %7, %6, %cst_9 {dimension_numbers = #tpu.dot_dimension_numbers<[1], [0], [0], [1], [0, 0, 1, 1], [], []>} : vector<32x32xf32>, vector<32x128xf32>, vector<32x128xf32> -> vector<32x128xf32>
    %10 = vector.broadcast %8 : vector<32x1xf32> to vector<32x128xf32>
    %11 = arith.addf %9, %10 : vector<32x128xf32>
    %12 = math.tanh %11 : vector<32x128xf32>
    %c0_10 = arith.constant 0 : index
    %c0_11 = arith.constant 0 : index
    %13 = vector.load %arg6[%c0_10, %c0_11] : memref<32x32xf32, #tpu.memory_space<vmem>>, vector<32x32xf32>
    %c0_12 = arith.constant 0 : index
    %c0_13 = arith.constant 0 : index
    %14 = vector.load %arg7[%c0_12, %c0_13] : memref<32x1xf32, #tpu.memory_space<vmem>>, vector<32x1xf32>
    %cst_14 = arith.constant dense<0.000000e+00> : vector<32x128xf32>
    %15 = tpu.matmul %13, %12, %cst_14 {dimension_numbers = #tpu.dot_dimension_numbers<[1], [0], [0], [1], [0, 0, 1, 1], [], []>} : vector<32x32xf32>, vector<32x128xf32>, vector<32x128xf32> -> vector<32x128xf32>
    %16 = vector.broadcast %14 : vector<32x1xf32> to vector<32x128xf32>
    %17 = arith.addf %15, %16 : vector<32x128xf32>
    %18 = math.tanh %17 : vector<32x128xf32>
    %c0_15 = arith.constant 0 : index
    %c0_16 = arith.constant 0 : index
    %19 = vector.load %arg8[%c0_15, %c0_16] : memref<1x32xf32, #tpu.memory_space<vmem>>, vector<1x32xf32>
    %c0_17 = arith.constant 0 : index
    %c0_18 = arith.constant 0 : index
    %20 = vector.load %arg9[%c0_17, %c0_18] : memref<1x1xf32, #tpu.memory_space<vmem>>, vector<1x1xf32>
    %cst_19 = arith.constant dense<0.000000e+00> : vector<1x128xf32>
    %21 = tpu.matmul %19, %18, %cst_19 {dimension_numbers = #tpu.dot_dimension_numbers<[1], [0], [0], [1], [0, 0, 1, 1], [], []>} : vector<1x32xf32>, vector<32x128xf32>, vector<1x128xf32> -> vector<1x128xf32>
    %22 = vector.broadcast %20 : vector<1x1xf32> to vector<1x128xf32>
    %23 = arith.addf %21, %22 : vector<1x128xf32>
    %c0_20 = arith.constant 0 : index
    %c0_21 = arith.constant 0 : index
    %24 = vector.load %arg10[%c0_20, %c0_21] : memref<1x128xf32, #tpu.memory_space<vmem>>, vector<1x128xf32>
    tpu.vector_store %arg10[%c0_20, %c0_21], %23 {strides = array<i32>} : memref<1x128xf32, #tpu.memory_space<vmem>>, vector<1x128xf32>,
    return
  }
  func.func @transform_0(%arg0: i32) -> (i32, i32) {
    %c0_i32 = arith.constant 0 : i32
    %c0_i32_0 = arith.constant 0 : i32
    return %c0_i32, %arg0 : i32, i32
  }
  func.func @transform_1(%arg0: i32) -> (i32, i32) {
    %c0_i32 = arith.constant 0 : i32
    %c0_i32_0 = arith.constant 0 : i32
    %c0_i32_1 = arith.constant 0 : i32
    return %c0_i32, %c0_i32_0 : i32, i32
  }
  func.func @transform_2(%arg0: i32) -> (i32, i32) {
    %c0_i32 = arith.constant 0 : i32
    %c0_i32_0 = arith.constant 0 : i32
    %c0_i32_1 = arith.constant 0 : i32
    return %c0_i32, %c0_i32_0 : i32, i32
  }
  func.func @transform_3(%arg0: i32) -> (i32, i32) {
    %c0_i32 = arith.constant 0 : i32
    %c0_i32_0 = arith.constant 0 : i32
    %c0_i32_1 = arith.constant 0 : i32
    return %c0_i32, %c0_i32_0 : i32, i32
  }
  func.func @transform_4(%arg0: i32) -> (i32, i32) {
    %c0_i32 = arith.constant 0 : i32
    %c0_i32_0 = arith.constant 0 : i32
    %c0_i32_1 = arith.constant 0 : i32
    return %c0_i32, %c0_i32_0 : i32, i32
  }
  func.func @transform_5(%arg0: i32) -> (i32, i32) {
    %c0_i32 = arith.constant 0 : i32
    %c0_i32_0 = arith.constant 0 : i32
    %c0_i32_1 = arith.constant 0 : i32
    return %c0_i32, %c0_i32_0 : i32, i32
  }
  func.func @transform_6(%arg0: i32) -> (i32, i32) {
    %c0_i32 = arith.constant 0 : i32
    %c0_i32_0 = arith.constant 0 : i32
    %c0_i32_1 = arith.constant 0 : i32
    return %c0_i32, %c0_i32_0 : i32, i32
  }
  func.func @transform_7(%arg0: i32) -> (i32, i32) {
    %c0_i32 = arith.constant 0 : i32
    %c0_i32_0 = arith.constant 0 : i32
    %c0_i32_1 = arith.constant 0 : i32
    return %c0_i32, %c0_i32_0 : i32, i32
  }
  func.func @transform_8(%arg0: i32) -> (i32, i32) {
    %c0_i32 = arith.constant 0 : i32
    %c0_i32_0 = arith.constant 0 : i32
    %c0_i32_1 = arith.constant 0 : i32
    return %c0_i32, %c0_i32_0 : i32, i32
  }
  func.func @transform_9(%arg0: i32) -> (i32, i32) {
    %c0_i32 = arith.constant 0 : i32
    %c0_i32_0 = arith.constant 0 : i32
    return %c0_i32, %arg0 : i32, i32
  }
}

</mosaic_0001>

<bundles_post_ra>
// kernel: tpu_custom_call.1
= control target key start
LH: loop header
LB: loop body
LE: loop exit
PB: predicated region body
PF: predicated region fallthrough
CT: control target
= control target key end

     0   :  { %s818_s0 = inlined_call_operand.vmem [shape: f32[4,128], index: 0, kind: input, shape index: {}]   ;;  %s819_s1 = inlined_call_operand.vmem [shape: f32[32,4], index: 1, kind: input, shape index: {}]   ;;  %s820_s2 = inlined_call_operand.vmem [shape: f32[32,1], index: 2, kind: input, shape index: {}]   ;;  %s821_s3 = inlined_call_operand.vmem [shape: f32[32,32], index: 3, kind: input, shape index: {}]   ;;  %s822_s4 = inlined_call_operand.vmem [shape: f32[32,1], index: 4, kind: input, shape index: {}]   ;;  %s823_s5 = inlined_call_operand.vmem [shape: f32[32,32], index: 5, kind: input, shape index: {}]   ;;  %s824_s6 = inlined_call_operand.vmem [shape: f32[32,1], index: 6, kind: input, shape index: {}]   ;;  %s825_s7 = inlined_call_operand.vmem [shape: f32[1,32], index: 7, kind: input, shape index: {}]   ;;  %s826_s8 = inlined_call_operand.<no memory space> [shape: f32[1,1], index: 8, kind: input, shape index: {}]   ;;  %s827_s9 = inlined_call_operand.hbm [shape: f32[1,128], index: 9, kind: output, shape index: {}]  }
   0x1   :  { %v14_v0 = vstv %s826_s8 }
   0x2   :  { %15 = vst [vmem:[#allocation2] sm:$0x1] %v14_v0 }
   0x3   :  { %v35_v1 = vld [vmem:[%s818_s0] sm:$0xf]  ;;  %vm77_vm0 = vcmask 1043456   ;;  %vm64_vm1 = vcmask 31744   ;;  %v37_v3 = vld [vmem:[%s819_s1 + $0x8] sm:$0xff]  ;;  %v38_v4 = vld [vmem:[%s819_s1 + $0x10] sm:$0xff] }
   0x4   :  { %v36_v2 = vld [vmem:[%s819_s1] sm:$0xff]  ;;  %568 = vmatprep.subr.msk.mxu0 %vm77_vm0, %v35_v1  ;;  %v43_v5 = vld [vmem:[%s820_s2 + $0x18] sm:$0xff]  ;;  %v667_v6 = vmov 0   ;;  %v41_v7 = vld [vmem:[%s820_s2 + $0x8] sm:$0xff] }
   0x5   :  { %570 = vmatprep.mubr.msk.f32.mxu0 %vm64_vm1, %v36_v2  ;;  %569 = vmatpush3.msk.msra.mxu0 %vm77_vm0, %v35_v1  ;;  %v39_v8 = vld [vmem:[%s819_s1 + $0x18] sm:$0xff]  ;;  %v42_v9 = vld [vmem:[%s820_s2 + $0x10] sm:$0xff]  ;;  %v40_v10 = vld [vmem:[%s820_s2] sm:$0xff] }
   0x6   :  { %619 = vset.pattern.permute.xlu0 %v667_v6  ;;  %571 = vmatmul.mubr.msk.f32.vlgmr.msra.gmra.mxu0 %vm64_vm1, %v37_v3 }
   0x7   :  { %61 = vperm.xlu0 %619, %v43_v5   ;;  %573 = vmatprep.mubr.msk.f32.mxu0 %vm64_vm1, %v38_v4 }
   0x8   :  { %620 = vset.pattern.permute.xlu1 %v667_v6 }
   0x9   :  { %51 = vperm.xlu1 %620, %v41_v7  }
   0xa   :  { %16 = vsyncpa [#allocation4], 0  ;;  %574 = vmatmul.mubr.msk.f32.gmra.mxu0 %vm64_vm1, %v39_v8  ;;  %v177_v11 = vld [vmem:[%s822_s4 + $0x18] sm:$0xff]  ;;  %v176_v12 = vld [vmem:[%s822_s4 + $0x10] sm:$0xff]  ;;  %vm198_vm2 = vcmask 261120   ;;  %v668_v60 = vmov 0.0  }
   0xb   :  { %56 = vperm.xlu0 %619, %v42_v9   ;;  %v175_v13 = vld [vmem:[%s822_s4 + $0x8] sm:$0xff]  ;;  %v174_v14 = vld [vmem:[%s822_s4] sm:$0xff]  ;;  %v307_v15 = vld [vmem:[%s824_s6 + $0x18] sm:$0xff]  ;;  %vm669_vm3 = vmmov 0   ;;  %s670_s10 = smov [#allocation3]  }
   0xc   :  { %v306_v16 = vld [vmem:[%s824_s6 + $0x10] sm:$0xff]  ;;  %v305_v17 = vld [vmem:[%s824_s6 + $0x8] sm:$0xff]  ;;  %v304_v18 = vld [vmem:[%s824_s6] sm:$0xff]  ;;  %s520_s2 = sshll.u32 %s670_s10, 4  ;;  %s521_s2 = int_to_ptr.vmem [resolvable:$true] %s520_s2 }
   0xd   :  { %46 = vperm.xlu1 %620, %v40_v10   ;;  %v430_v19 = vld [vmem:[#allocation2] sm:$0x1]  ;;  %v171_v37 = vld [vmem:[%s821_s3 + $0x8] sm:$0xff]  ;;  %v172_v38 = vld [vmem:[%s821_s3 + $0x10] sm:$0xff]  ;;  %s645_s11 = scalar_lea.vmem %s521_s2, 16  ;;  %p650_p1 = scmp.lt.s32.totalorder %s521_s2, %s521_s2 }
   0xe   :  { %v170_v20 = vld [vmem:[%s821_s3] sm:$0xff]  ;;  %v173_v39 = vld [vmem:[%s821_s3 + $0x18] sm:$0xff]  ;;  %v301_v57 = vld [vmem:[%s823_s5 + $0x8] sm:$0xff]  ;;  %p646_p0 = scmp.ne.s32.totalorder %s521_s2, %s645_s11 }
   0xf   :  { %195 = vperm.xlu0 %619, %v177_v11   ;;  %584 = vmatprep.mubr.msk.f32.mxu1 %vm198_vm2, %v170_v20  ;;  %v300_v40 = vld [vmem:[%s823_s5] sm:$0xff]  ;;  %v302_v58 = vld [vmem:[%s823_s5 + $0x10] sm:$0xff]  ;;  %v303_v59 = vld [vmem:[%s823_s5 + $0x18] sm:$0xff] }
  0x10   :  { %598 = vmatprep.mubr.msk.f32.mxu0 %vm198_vm2, %v300_v40 }
  0x11   :  { %190 = vperm.xlu1 %620, %v176_v12   ;;  %v429_v12 = vld [vmem:[%s825_s7] sm:$0x1]  ;;  %s649_s7 = scalar_lea.vmem %s521_s2, 32 }
  0x12   :  { %p651_p2 = scmp.lt.s32.totalorder %s649_s7, %s645_s11 }
  0x13   :  { %185 = vperm.xlu0 %619, %v175_v13  }
  0x14   :  { %p652_p3 = por %p651_p2, %p650_p1 }
  0x15   :  { %180 = vperm.xlu1 %620, %v174_v14   ;;  %v436_v14 = vlaneseq }
  0x16   :  { %p653_p4 = pnand %p652_p3, %p646_p0 }
  0x17   :  { %325 = vperm.xlu0 %619, %v307_v15   ;;  %v437_v15 = vshrl.u32 %v436_v14, 7 }
  0x19   :  { %320 = vperm.xlu1 %620, %v306_v16   ;;  %v438_v16 = vsub.s32 0, %v437_v15 }
  0x1b   :  { %315 = vperm.xlu0 %619, %v305_v17  }
  0x1d   :  { %310 = vperm.xlu1 %620, %v304_v18  }
  0x1f   :  { %433 = vperm.xlu0 %619, %v430_v19  }
  0x82   :  { %v62_v21 = vpop.permute.xlu0 %61 }
  0x84   :  { %v52_v23 = vpop.permute.xlu1 %51 }
  0x86   :  { %v57_v27 = vpop.permute.xlu0 %56 }
  0x88   :  { %v47_v31 = vpop.permute.xlu1 %46 }
  0x8a   :  { %v196_v41 = vpop.permute.xlu0 %195 }
  0x8c   :  { %v191_v43 = vpop.permute.xlu1 %190 }
  0x8e   :  { %v186_v47 = vpop.permute.xlu0 %185 }
  0x90   :  { %v181_v51 = vpop.permute.xlu1 %180 }
  0x92   :  { %v326_v61 = vpop.permute.xlu0 %325 }
  0x94   :  { %v321_v63 = vpop.permute.xlu1 %320 }
  0x96   :  { %v316_v3 = vpop.permute.xlu0 %315 }
  0x98   :  { %v311_v7 = vpop.permute.xlu1 %310 }
  0x9a   :  { %v434_v17 = vpop.permute.xlu0 %433 }
  0x9b   :  { %v439_v18 = vrot.slane %v434_v17, %v438_v16 }
  0xc6   :  { %v572_v22 = vpop.f32.mrf.mxu0 }
  0xc7   :  { %v153_v29 = vadd.f32 %v572_v22, %v52_v23 }
  0xc8   :  { %v147_v24 = vpop.f32.mrf.mxu0 }
  0xc9   :  { %v148_v32 = vadd.f32 %v147_v24, %v47_v31 }
  0xca   :  { %v575_v25 = vpop.f32.mrf.mxu0 }
  0xcb   :  { %v163_v26 = vadd.f32 %v575_v25, %v62_v21 }
  0xcc   :  { %v157_v28 = vpop.f32.mrf.mxu0 }
  0xcd   :  { %621 = vtanh.f32 %v163_v26  ;;  %v158_v30 = vadd.f32 %v157_v28, %v57_v27 }
  0xcf   :  { %623 = vtanh.f32 %v158_v30 }
  0xd0   :  { %625 = vtanh.f32 %v153_v29 }
  0xd1   :  { %627 = vtanh.f32 %v148_v32 }
  0xda   :  { %v622_v33 = vpop.eup %621 }
  0xdb   :  { %576 = vmatprep.subr.mxu1 %v622_v33 }
  0xdc   :  { %v624_v34 = vpop.eup %623  ;;  %577 = vmatpush3.msra.mxu1 %v622_v33 }
  0xdd   :  { %578 = vmatprep.subr.mxu1 %v624_v34  ;;  %v626_v35 = vpop.eup %625 }
  0xde   :  { %579 = vmatpush3.msra.mxu1 %v624_v34  ;;  %v628_v36 = vpop.eup %627 }
  0xdf   :  { %580 = vmatprep.subr.mxu1 %v626_v35 }
  0xe0   :  { %581 = vmatpush3.msra.mxu1 %v626_v35 }
  0xe1   :  { %582 = vmatprep.subr.mxu1 %v628_v36 }
  0xe2   :  { %583 = vmatpush3.msra.mxu1 %v628_v36 }
  0xe3   :  { %585 = vmatmul.mubr.msk.f32.vlgmr.msra.gmra.mxu1 %vm198_vm2, %v171_v37  ;;  %604 = vmatprep.subr.mxu1 %v668_v60 }
  0xe4   :  { %587 = vmatprep.mubr.msk.f32.mxu1 %vm198_vm2, %v172_v38 }
  0xe7   :  { %588 = vmatmul.mubr.msk.f32.gmra.mxu1 %vm198_vm2, %v173_v39 }
  0xe8   :  { %612 = vmatprep.mubr.msk.f32.mxu1 %vm669_vm3, %v668_v60 }
 0x1a3   :  { %v586_v42 = vpop.f32.mrf.mxu1 }
 0x1a4   :  { %v283_v49 = vadd.f32 %v586_v42, %v186_v47 }
 0x1a5   :  { %v277_v44 = vpop.f32.mrf.mxu1 }
 0x1a6   :  { %v278_v52 = vadd.f32 %v277_v44, %v181_v51 }
 0x1a7   :  { %v589_v45 = vpop.f32.mrf.mxu1 }
 0x1a8   :  { %v293_v46 = vadd.f32 %v589_v45, %v196_v41 }
 0x1a9   :  { %v287_v48 = vpop.f32.mrf.mxu1 }
 0x1aa   :  { %629 = vtanh.f32 %v293_v46  ;;  %v288_v50 = vadd.f32 %v287_v48, %v191_v43 }
 0x1ac   :  { %631 = vtanh.f32 %v288_v50 }
 0x1ad   :  { %633 = vtanh.f32 %v283_v49 }
 0x1ae   :  { %635 = vtanh.f32 %v278_v52 }
 0x1b7   :  { %v630_v53 = vpop.eup %629 }
 0x1b8   :  { %590 = vmatprep.subr.mxu0 %v630_v53 }
 0x1b9   :  { %v632_v54 = vpop.eup %631  ;;  %591 = vmatpush3.msra.mxu0 %v630_v53 }
 0x1ba   :  { %592 = vmatprep.subr.mxu0 %v632_v54  ;;  %v634_v55 = vpop.eup %633 }
 0x1bb   :  { %593 = vmatpush3.msra.mxu0 %v632_v54  ;;  %v636_v56 = vpop.eup %635 }
 0x1bc   :  { %594 = vmatprep.subr.mxu0 %v634_v55 }
 0x1bd   :  { %595 = vmatpush3.msra.mxu0 %v634_v55 }
 0x1be   :  { %596 = vmatprep.subr.mxu0 %v636_v56 }
 0x1bf   :  { %597 = vmatpush3.msra.mxu0 %v636_v56 }
 0x1c0   :  { %599 = vmatmul.mubr.msk.f32.vlgmr.msra.gmra.mxu0 %vm198_vm2, %v301_v57 }
 0x1c1   :  { %601 = vmatprep.mubr.msk.f32.mxu0 %vm198_vm2, %v302_v58 }
 0x1c4   :  { %602 = vmatmul.mubr.msk.f32.gmra.mxu0 %vm198_vm2, %v303_v59 }
 0x280   :  { %v600_v62 = vpop.f32.mrf.mxu0 }
 0x281   :  { %v412_v5 = vadd.f32 %v600_v62, %v316_v3 }
 0x282   :  { %v406_v0 = vpop.f32.mrf.mxu0 }
 0x283   :  { %v407_v8 = vadd.f32 %v406_v0, %v311_v7 }
 0x284   :  { %v603_v1 = vpop.f32.mrf.mxu0 }
 0x285   :  { %v422_v2 = vadd.f32 %v603_v1, %v326_v61 }
 0x286   :  { %v416_v4 = vpop.f32.mrf.mxu0 }
 0x287   :  { %637 = vtanh.f32 %v422_v2  ;;  %v417_v6 = vadd.f32 %v416_v4, %v321_v63 }
 0x289   :  { %639 = vtanh.f32 %v417_v6 }
 0x28a   :  { %641 = vtanh.f32 %v412_v5 }
 0x28b   :  { %643 = vtanh.f32 %v407_v8 }
 0x294   :  { %v638_v9 = vpop.eup %637 }
 0x295   :  { %605 = vmatpush3.msra.mxu1 %v638_v9 }
 0x296   :  { %v640_v10 = vpop.eup %639  ;;  %606 = vmatprep.subr.mxu1 %v668_v60 }
 0x297   :  { %607 = vmatpush3.msra.mxu1 %v640_v10  ;;  %v642_v11 = vpop.eup %641 }
 0x298   :  { %608 = vmatprep.subr.mxu1 %v668_v60  ;;  %v644_v13 = vpop.eup %643 }
 0x299   :  { %609 = vmatpush3.msra.mxu1 %v642_v11 }
 0x29a   :  { %610 = vmatprep.subr.mxu1 %v668_v60 }
 0x29b   :  { %611 = vmatpush3.msra.mxu1 %v644_v13 }
 0x29c   :  { %613 = vmatmul.mubr.msk.f32.vlgmr.msra.gmra.mxu1 %vm198_vm2, %v429_v12 }
 0x35c   :  { %v509_v19 = vpop.f32.mrf.mxu1 }
 0x35d   :  { %v510_v20 = vadd.f32 %v509_v19, %v439_v18 }
 0x35e   :  { %v614_v21 = vpop.f32.mrf.mxu1 }
 0x35f   :  { %513 = vst [vmem:[#allocation3] sm:$0x1] %v510_v20 }
 0x360   :  { %656 = shalt.err (!%p653_p4)
}
 0x361   :  { %523 = dma.vmem_to_hbm [thread:$0]  %s521_s2, 16, %s827_s9, [#allocation4]  }
 0x362   :  { %665 = dma.done.wait [#allocation4], 16  }
 0x363   :  { %666 = vsyncadd [#allocation4], 4294967280 }
 0x364   :  { %527 = vsyncpa [#allocation4], 1 }

</bundles_post_ra>
